<compile_context>
chip_gen: v7x
topology: tpu7x:2x2x1
jax: 0.10.0
libtpu: 0.0.40
codegen_flags: <defaults>
</compile_context>

<pallas_src>
import functools

import jax
import jax.numpy as jnp
from jax.experimental import pallas as pl
from jax.experimental.pallas import tpu as pltpu


def valuenet_kernel(xT_ref, w1T_ref, b1_ref, w2_ref, b2_ref, o_ref):
    # fc1 + ReLU: h[H, TB] = relu(w1T[H, S] @ xT[S, TB] + b1[H, 1])
    h = jnp.dot(w1T_ref[...], xT_ref[...], preferred_element_type=jnp.float32)
    h = jnp.maximum(h + b1_ref[...], 0.0)                      # (H, TB) + (H, 1)
    # fc2 as VPU multiply + sublane (XLU) reduce — avoids an N=1 MXU pass.
    v = jnp.sum(h * w2_ref[...], axis=0, keepdims=True)        # (1, TB)
    o_ref[...] = (v + b2_ref[0, 0]).astype(o_ref.dtype)        # scalar bias from SMEM


@functools.partial(jax.jit, static_argnames=("block_b",))
def value_net_forward(x, w1, b1, w2, b2, *, block_b=1024):
    """x: (B, state_dim) f32; w1: (S, H); b1: (H,); w2: (H,); b2: ().  Returns (B, 1) f32."""
    B, S = x.shape
    H = w1.shape[1]

    # Layout plumbing (cheap wrapper-side transposes/reshapes): batch ends up on lanes.
    xT = x.T.astype(jnp.float32)                   # (S, B)
    w1T = w1.T.astype(jnp.float32)                 # (H, S)
    b1c = b1.reshape(H, 1).astype(jnp.float32)     # (H, 1)
    w2c = w2.reshape(H, 1).astype(jnp.float32)     # (H, 1)
    b2s = jnp.reshape(b2, (1, 1)).astype(jnp.float32)  # (1, 1) scalar -> SMEM

    # Large lane-dense batch tiles. If B <= block_b a single full-extent block is
    # used (block dims == array dims, satisfying the (8,128) rule). For big B,
    # block_b is a multiple of 128; a partial final tile is safe because each
    # output column depends only on its own x column and OOB stores are dropped.
    tb = B if B <= block_b else block_b
    grid = (pl.cdiv(B, tb),)

    out = pl.pallas_call(
        valuenet_kernel,
        out_shape=jax.ShapeDtypeStruct((1, B), jnp.float32),
        grid=grid,
        in_specs=[
            pl.BlockSpec((S, tb), lambda i: (0, i)),                 # xT batch tile
            pl.BlockSpec((H, S), lambda i: (0, 0)),                  # w1T resident
            pl.BlockSpec((H, 1), lambda i: (0, 0)),                  # b1 resident
            pl.BlockSpec((H, 1), lambda i: (0, 0)),                  # w2 resident
            pl.BlockSpec(memory_space=pltpu.MemorySpace.SMEM),       # b2 scalar
        ],
        out_specs=pl.BlockSpec((1, tb), lambda i: (0, i)),           # lane-dense output
        compiler_params=pltpu.CompilerParams(
            dimension_semantics=("parallel",),                       # megacore on v7x
        ),
    )(xT, w1T, b1c, w2c, b2s)
    return out.reshape(B, 1)


def init_params(key, state_dim, hidden_dim):
    """Deterministic synthetic init (PyTorch-Linear-like uniform ranges)."""
    k1, k2, k3, k4 = jax.random.split(key, 4)
    bound1 = 1.0 / jnp.sqrt(state_dim)
    bound2 = 1.0 / jnp.sqrt(hidden_dim)
    # w1 stored as [in, out]; w2 as a length-H vector; b2 a scalar.
    w1 = jax.random.uniform(k1, (state_dim, hidden_dim), jnp.float32, -bound1, bound1)
    b1 = jax.random.uniform(k2, (hidden_dim,), jnp.float32, -bound1, bound1)
    w2 = jax.random.uniform(k3, (hidden_dim,), jnp.float32, -bound2, bound2)
    b2 = jax.random.uniform(k4, (), jnp.float32, -bound2, bound2)
    return w1, b1, w2, b2


if __name__ == "__main__":
    key = jax.random.PRNGKey(0)
    kx, kp = jax.random.split(key)

    B, state_dim, hidden_dim = 8, 4, 32
    x = jax.random.normal(kx, (B, state_dim), jnp.float32)
    w1, b1, w2, b2 = init_params(kp, state_dim, hidden_dim)

    out = value_net_forward(x, w1, b1, w2, b2)
    out = jax.block_until_ready(out)

    # Pure-JAX reference of the same semantics: relu(x @ W1 + b1) @ w2 + b2.
    ref = jnp.maximum(x @ w1 + b1[None, :], 0.0) @ w2[:, None] + b2
    assert out.shape == (B, 1)
    assert jnp.allclose(out, ref, atol=1e-5, rtol=1e-5)

    print("KERNEL_OK")
</pallas_src>

<mosaic_0001>
module attributes {stable_mosaic.version = 11 : i64} {
  func.func @valuenet_kernel(%arg0: i32, %arg1: memref<4x8xf32, #tpu.memory_space<vmem>>, %arg2: memref<32x4xf32, #tpu.memory_space<vmem>>, %arg3: memref<32x1xf32, #tpu.memory_space<vmem>>, %arg4: memref<32x1xf32, #tpu.memory_space<vmem>>, %arg5: memref<1x1xf32, #tpu.memory_space<smem>>, %arg6: memref<1x8xf32, #tpu.memory_space<vmem>>) attributes {dimension_semantics = [#tpu.dimension_semantics<parallel>], iteration_bounds = array<i64: 1>, scalar_prefetch = 0 : i64, scratch_operands = 0 : i64, tpu.core_type = #tpu.core_type<tc>, window_params = [{transform_indices = @transform_0, window_bounds = array<i64: 4, 8>}, {pipeline_mode = #tpu.pipeline_mode<synchronous>, transform_indices = @transform_1, window_bounds = array<i64: 32, 4>}, {pipeline_mode = #tpu.pipeline_mode<synchronous>, transform_indices = @transform_2, window_bounds = array<i64: 32, 1>}, {pipeline_mode = #tpu.pipeline_mode<synchronous>, transform_indices = @transform_3, window_bounds = array<i64: 32, 1>}, {transform_indices = @transform_4, window_bounds = array<i64: 1, 1>}, {transform_indices = @transform_5, window_bounds = array<i64: 1, 8>}]} {
    %c0 = arith.constant 0 : index
    %c0_0 = arith.constant 0 : index
    %0 = vector.load %arg2[%c0, %c0_0] : memref<32x4xf32, #tpu.memory_space<vmem>>, vector<32x4xf32>
    %c0_1 = arith.constant 0 : index
    %c0_2 = arith.constant 0 : index
    %1 = vector.load %arg1[%c0_1, %c0_2] : memref<4x8xf32, #tpu.memory_space<vmem>>, vector<4x8xf32>
    %cst = arith.constant dense<0.000000e+00> : vector<32x8xf32>
    %2 = tpu.matmul %0, %1, %cst {dimension_numbers = #tpu.dot_dimension_numbers<[1], [0], [0], [1], [0, 0, 1, 1], [], []>} : vector<32x4xf32>, vector<4x8xf32>, vector<32x8xf32> -> vector<32x8xf32>
    %c0_3 = arith.constant 0 : index
    %c0_4 = arith.constant 0 : index
    %3 = vector.load %arg3[%c0_3, %c0_4] : memref<32x1xf32, #tpu.memory_space<vmem>>, vector<32x1xf32>
    %4 = vector.broadcast %3 : vector<32x1xf32> to vector<32x8xf32>
    %5 = arith.addf %2, %4 : vector<32x8xf32>
    %cst_5 = arith.constant 0.000000e+00 : f32
    %6 = vector.broadcast %cst_5 : f32 to vector<32x8xf32>
    %7 = arith.maximumf %5, %6 : vector<32x8xf32>
    %c0_6 = arith.constant 0 : index
    %c0_7 = arith.constant 0 : index
    %8 = vector.load %arg4[%c0_6, %c0_7] : memref<32x1xf32, #tpu.memory_space<vmem>>, vector<32x1xf32>
    %9 = vector.broadcast %8 : vector<32x1xf32> to vector<32x8xf32>
    %10 = arith.mulf %7, %9 : vector<32x8xf32>
    %cst_8 = arith.constant dense<0.000000e+00> : vector<8xf32>
    %11 = vector.multi_reduction <add>, %10, %cst_8 [0] : vector<32x8xf32> to vector<8xf32>
    %12 = vector.shape_cast %11 : vector<8xf32> to vector<1x8xf32>
    %c0_9 = arith.constant 0 : index
    %c0_10 = arith.constant 0 : index
    %13 = memref.load %arg5[%c0_9, %c0_10] : memref<1x1xf32, #tpu.memory_space<smem>>
    %14 = vector.broadcast %13 : f32 to vector<1x8xf32>
    %15 = arith.addf %12, %14 : vector<1x8xf32>
    %c0_11 = arith.constant 0 : index
    %c0_12 = arith.constant 0 : index
    %16 = vector.load %arg6[%c0_11, %c0_12] : memref<1x8xf32, #tpu.memory_space<vmem>>, vector<1x8xf32>
    tpu.vector_store %arg6[%c0_11, %c0_12], %15 {strides = array<i32>} : memref<1x8xf32, #tpu.memory_space<vmem>>, vector<1x8xf32>,
    return
  }
  func.func @transform_0(%arg0: i32) -> (i32, i32) {
    %c0_i32 = arith.constant 0 : i32
    %c0_i32_0 = arith.constant 0 : i32
    return %c0_i32, %arg0 : i32, i32
  }
  func.func @transform_1(%arg0: i32) -> (i32, i32) {
    %c0_i32 = arith.constant 0 : i32
    %c0_i32_0 = arith.constant 0 : i32
    %c0_i32_1 = arith.constant 0 : i32
    return %c0_i32, %c0_i32_0 : i32, i32
  }
  func.func @transform_2(%arg0: i32) -> (i32, i32) {
    %c0_i32 = arith.constant 0 : i32
    %c0_i32_0 = arith.constant 0 : i32
    %c0_i32_1 = arith.constant 0 : i32
    return %c0_i32, %c0_i32_0 : i32, i32
  }
  func.func @transform_3(%arg0: i32) -> (i32, i32) {
    %c0_i32 = arith.constant 0 : i32
    %c0_i32_0 = arith.constant 0 : i32
    %c0_i32_1 = arith.constant 0 : i32
    return %c0_i32, %c0_i32_0 : i32, i32
  }
  func.func @transform_4(%arg0: i32) -> (i32, i32) {
    %c0_i32 = arith.constant 0 : i32
    %c0_i32_0 = arith.constant 0 : i32
    %c0_i32_1 = arith.constant 0 : i32
    return %c0_i32, %c0_i32_0 : i32, i32
  }
  func.func @transform_5(%arg0: i32) -> (i32, i32) {
    %c0_i32 = arith.constant 0 : i32
    %c0_i32_0 = arith.constant 0 : i32
    return %c0_i32, %arg0 : i32, i32
  }
}

</mosaic_0001>

<bundles_post_ra>
// kernel: value_net_forward.1
= control target key start
LH: loop header
LB: loop body
LE: loop exit
PB: predicated region body
PF: predicated region fallthrough
CT: control target
= control target key end

     0   :  { %vm64_vm0 = vcmask 1043456   ;;  %vm51_vm1 = vcmask 31744   ;;  %s352_s0 = inlined_call_operand.vmem [shape: f32[4,8], index: 0, kind: input, shape index: {}]   ;;  %s353_s1 = inlined_call_operand.vmem [shape: f32[32,4], index: 1, kind: input, shape index: {}]   ;;  %s354_s2 = inlined_call_operand.vmem [shape: f32[32,1], index: 2, kind: input, shape index: {}]   ;;  %s355_s3 = inlined_call_operand.vmem [shape: f32[32,1], index: 3, kind: input, shape index: {}]   ;;  %s356_s4 = inlined_call_operand.<no memory space> [shape: f32[1,1], index: 4, kind: input, shape index: {}]   ;;  %s357_s5 = inlined_call_operand.hbm [shape: f32[1,8], index: 5, kind: output, shape index: {}]  }
   0x1   :  { %v26_v0 = vld [vmem:[%s352_s0] sm:$0xf]  ;;  %v24_v2 = vld [vmem:[%s353_s1 + $0x10] sm:$0xff]  ;;  %v23_v3 = vld [vmem:[%s353_s1 + $0x8] sm:$0xff] }
   0x2   :  { %v22_v1 = vld [vmem:[%s353_s1] sm:$0xff]  ;;  %228 = vmatprep.subr.msk.mxu0 %vm64_vm0, %v26_v0  ;;  %236 = vmatprep.subr.msk.mxu1 %vm64_vm0, %v26_v0  ;;  %v25_v4 = vld [vmem:[%s353_s1 + $0x18] sm:$0xff]  ;;  %v29_v6 = vld [vmem:[%s354_s2 + $0x10] sm:$0xff] }
   0x3   :  { %229 = vmatpush3.msk.msra.mxu0 %vm64_vm0, %v26_v0  ;;  %237 = vmatpush3.msk.msra.mxu1 %vm64_vm0, %v26_v0  ;;  %v27_v5 = vld [vmem:[%s354_s2] sm:$0xff] }
   0x4   :  { %230 = vmatprep.mubr.msk.f32.mxu0 %vm51_vm1, %v22_v1  ;;  %233 = vmatprep.mubr.msk.f32.mxu1 %vm51_vm1, %v24_v2 }
   0x5   :  { %231 = vmatmul.mubr.msk.f32.vlgmr.msra.gmra.mrb[0].mxu0 %vm51_vm1, %v23_v3  ;;  %234 = vmatmul.mubr.msk.f32.vlgmr.msra.gmra.mrb[0].mxu1 %vm51_vm1, %v25_v4 }
   0x6   :  { %11 = vsyncpa [#allocation4], 0  ;;  %v266_v7 = vmov 0   ;;  %v28_v8 = vld [vmem:[%s354_s2 + $0x8] sm:$0xff]  ;;  %v30_v9 = vld [vmem:[%s354_s2 + $0x18] sm:$0xff]  ;;  %vm185_vm2 = vcmask 64512   ;;  %v200_v50 = vstv %s356_s4 }
   0x7   :  { %240 = vset.pattern.permute.xlu0 %v266_v7  ;;  %241 = vset.pattern.permute.xlu1 %v266_v7  ;;  %v157_v10 = vld [vmem:[%s355_s3] sm:$0xff]  ;;  %v158_v11 = vld [vmem:[%s355_s3 + $0x8] sm:$0xff]  ;;  %v159_v12 = vld [vmem:[%s355_s3 + $0x10] sm:$0xff]  ;;  %s267_s17 = smov [#allocation3]   ;;  %vm202_vm3 = vcmask 57344  }
   0x8   :  { %33 = vperm.xlu0 %240, %v27_v5   ;;  %43 = vperm.xlu1 %241, %v29_v6   ;;  %v160_v13 = vld [vmem:[%s355_s3 + $0x18] sm:$0xff]  ;;  %s210_s18 = sshll.u32 %s267_s17, 4  ;;  %s211_s18 = int_to_ptr.vmem [resolvable:$true] %s210_s18 }
   0x9   :  { %s242_s19 = scalar_lea.vmem %s211_s18, 16  ;;  %s246_s20 = scalar_lea.vmem %s211_s18, 32 }
   0xa   :  { %p243_p0 = scmp.ne.s32.totalorder %s211_s18, %s242_s19  ;;  %p247_p1 = scmp.lt.s32.totalorder %s211_s18, %s211_s18 }
   0xb   :  { %p248_p2 = scmp.lt.s32.totalorder %s246_s20, %s242_s19 }
   0xc   :  { %38 = vperm.xlu0 %240, %v28_v8   ;;  %48 = vperm.xlu1 %241, %v30_v9  }
   0xd   :  { %p249_p3 = por %p248_p2, %p247_p1 }
   0xf   :  { %p250_p4 = pnand %p249_p3, %p243_p0 }
  0x10   :  { %163 = vperm.xlu0 %240, %v157_v10   ;;  %168 = vperm.xlu1 %241, %v158_v11  }
  0x14   :  { %173 = vperm.xlu0 %240, %v159_v12   ;;  %178 = vperm.xlu1 %241, %v160_v13  }
  0x87   :  { %v34_v14 = vpop.permute.xlu0 %33  ;;  %v44_v15 = vpop.permute.xlu1 %43 }
  0x8b   :  { %v39_v16 = vpop.permute.xlu0 %38  ;;  %v49_v17 = vpop.permute.xlu1 %48 }
  0x8f   :  { %v164_v18 = vpop.permute.xlu0 %163  ;;  %v169_v19 = vpop.permute.xlu1 %168 }
  0x93   :  { %v174_v32 = vpop.permute.xlu0 %173  ;;  %v179_v36 = vpop.permute.xlu1 %178 }
  0xd8   :  { %v232_v20 = vpop.f32.mrb[0].mxu0  ;;  %v235_v21 = vpop.f32.mrb[0].mxu1 }
  0xd9   :  { %v140_v22 = vadd.f32 %v232_v20, %v39_v16  ;;  %v150_v23 = vadd.f32 %v235_v21, %v49_v17  ;;  %v134_v24 = vpop.f32.mrb[1].mxu0  ;;  %v144_v25 = vpop.f32.mrb[1].mxu1 }
  0xda   :  { %v135_v26 = vadd.f32 %v134_v24, %v34_v14  ;;  %v145_v27 = vadd.f32 %v144_v25, %v44_v15 }
  0xdb   :  { %v154_v28 = vmax.f32 %v140_v22, 0.0  ;;  %v156_v29 = vmax.f32 %v150_v23, 0.0 }
  0xdc   :  { %v153_v30 = vmax.f32 %v135_v26, 0.0  ;;  %v155_v31 = vmax.f32 %v145_v27, 0.0 }
  0xdd   :  { %v182_v33 = vmul.f32 %v169_v19, %v154_v28  ;;  %v184_v38 = vmul.f32 %v179_v36, %v156_v29 }
  0xde   :  { %v181_v34 = vmul.f32 %v164_v18, %v153_v30  ;;  %v183_v35 = vmul.f32 %v174_v32, %v155_v31 }
  0xdf   :  { %v187_v37 = vsel %vm185_vm2, %v182_v33, 0.0  ;;  %v191_v43 = vsel %vm185_vm2, %v184_v38, 0.0 }
  0xe0   :  { %v186_v39 = vsel %vm185_vm2, %v181_v34, 0.0  ;;  %v189_v41 = vsel %vm185_vm2, %v183_v35, 0.0 }
  0xe1   :  { %v188_v40 = vadd.f32 %v187_v37, %v186_v39 }
  0xe3   :  { %v190_v42 = vadd.f32 %v189_v41, %v188_v40 }
  0xe5   :  { %v192_v44 = vadd.f32 %v191_v43, %v190_v42 }
  0xe7   :  { %v193_v45 = vrot.slane %v192_v44, 4 }
  0xe9   :  { %v194_v46 = vadd.f32 %v193_v45, %v192_v44 }
  0xeb   :  { %v195_v47 = vrot.slane %v194_v46, 2 }
  0xed   :  { %v196_v48 = vadd.f32 %v195_v47, %v194_v46 }
  0xef   :  { %v197_v49 = vrot.slane %v196_v48, 1 }
  0xf1   :  { %v198_v51 = vadd.f32 %v197_v49, %v196_v48 }
  0xf3   :  { %v201_v52 = vadd.f32 %v200_v50, %v198_v51 }
  0xf5   :  { %203 = vst.msk [vmem:[#allocation3] sm:$0x1] %vm202_vm3, %v201_v52 }
  0xf6   :  { %253 = shalt.err (!%p250_p4)
}
  0xf7   :  { %s254_s23 = scalar_lea.hbm %s357_s5, 16 }
  0xf8   :  { %p255_p5 = scmp.ne.s32.totalorder %s357_s5, %s254_s23  ;;  %p258_p6 = scmp.lt.u32.totalorder %s254_s23, %s357_s5 }
  0xfa   :  { %p260_p7 = pnand %p258_p6, %p255_p5 }
  0xfc   :  { %263 = shalt.err (!%p260_p7)
}
  0xfd   :  { %213 = dma.vmem_to_hbm [thread:$0]  %s211_s18, 16, %s357_s5, [#allocation4]  }
  0xfe   :  { %264 = dma.done.wait [#allocation4], 16  }
  0xff   :  { %265 = vsyncadd [#allocation4], 4294967280 }
 0x100   :  { %217 = vsyncpa [#allocation4], 1 }

</bundles_post_ra>
